<compile_context>
chip_gen: v6e
topology: v6e:2x2x1
jax: 0.10.0
libtpu: 0.0.40
codegen_flags: <defaults>
</compile_context>

<pallas_src>
import functools

import jax
import jax.numpy as jnp
from jax.experimental import pallas as pl
from jax.experimental.pallas import tpu as pltpu


# ----------------------------- activations ---------------------------------
def _relu(x):
    return jnp.maximum(x, 0.0)


def _leaky_relu(x, negative_slope=0.01):
    return jnp.where(x >= 0, x, negative_slope * x)


def _tanh(x):
    return jnp.tanh(x)


def _sigmoid(x):
    # stable sigmoid via tanh (EUP op, lowers cleanly in Mosaic)
    return 0.5 * (jnp.tanh(0.5 * x) + 1.0)


def _selu(x):
    # constants match torch.nn.SELU
    alpha = 1.6732632423543772848170429916717
    scale = 1.0507009873554804934193349852946
    return scale * jnp.where(x > 0, x, alpha * (jnp.exp(x) - 1.0))


def _softplus(x):
    # stable softplus using only exp/log
    return jnp.maximum(x, 0.0) + jnp.log(1.0 + jnp.exp(-jnp.abs(x)))


def _identity(x):
    return x


_STR_TO_ACT = {
    "relu": _relu,
    "tanh": _tanh,
    "leaky_relu": _leaky_relu,
    "sigmoid": _sigmoid,
    "selu": _selu,
    "softplus": _softplus,
    "identity": _identity,
}


def _round_up(x, m):
    return ((x + m - 1) // m) * m


def _pick_feature_tile(dim_pad, pref=512):
    # dim_pad is a multiple of 128; return the largest tile in {pref,256,128}
    # that divides it.
    for t in (pref, 256, 128):
        if t <= dim_pad and dim_pad % t == 0:
            return t
    return dim_pad


# ---------------------- fused whole-MLP Pallas kernel ------------------------
def _fused_mlp_kernel(x_ref, w_ref, b_ref, o_ref, *, acts, compute_dtype):
    # x_ref: (tm, Dmax) f32   w_ref: (L, Dmax, Dmax) compute_dtype
    # b_ref: (L, 1, Dmax) f32 o_ref: (tm, Dmax) f32
    # Activations never leave VMEM/vregs between layers.
    h = x_ref[...].astype(jnp.float32)
    for l, act in enumerate(acts):                       # static unroll over layers
        y = jnp.dot(h.astype(compute_dtype), w_ref[l],
                    preferred_element_type=jnp.float32) + b_ref[l]
        h = act(y)
    o_ref[...] = h.astype(o_ref.dtype)


def mlp_fused_forward(x, w_stack, b_stack, acts, in_dim, out_dim):
    """Whole MLP in a single pallas_call. x: (B, in_dim) f32."""
    B = x.shape[0]
    L, Dmax, _ = w_stack.shape
    tm = min(256, _round_up(max(B, 1), 8))
    B_pad = _round_up(B, tm)
    x_pad = jnp.pad(x.astype(jnp.float32),
                    ((0, B_pad - B), (0, Dmax - in_dim)))
    act_fns = tuple(_STR_TO_ACT[a] for a in acts)
    kernel = functools.partial(_fused_mlp_kernel, acts=act_fns,
                               compute_dtype=w_stack.dtype)
    out = pl.pallas_call(
        kernel,
        out_shape=jax.ShapeDtypeStruct((B_pad, Dmax), jnp.float32),
        grid_spec=pltpu.PrefetchScalarGridSpec(
            num_scalar_prefetch=0,
            grid=(B_pad // tm,),
            in_specs=[
                pl.BlockSpec((tm, Dmax), lambda i: (i, 0)),
                pl.BlockSpec((L, Dmax, Dmax), lambda i: (0, 0, 0)),
                pl.BlockSpec((L, 1, Dmax), lambda i: (0, 0, 0)),
            ],
            out_specs=pl.BlockSpec((tm, Dmax), lambda i: (i, 0)),
        ),
        compiler_params=pltpu.CompilerParams(
            dimension_semantics=("parallel",),
        ),
    )(x_pad, w_stack, b_stack)
    return out[:B, :out_dim]


# ------------- per-layer M/N/K-tiled fallback (large layers) -----------------
def _tiled_linear_act_kernel(x_ref, w_ref, b_ref, o_ref, acc_ref, *,
                             act, compute_dtype):
    k = pl.program_id(2)

    @pl.when(k == 0)
    def _():
        acc_ref[...] = jnp.zeros_like(acc_ref)

    acc_ref[...] += jnp.dot(x_ref[...].astype(compute_dtype), w_ref[...],
                            preferred_element_type=jnp.float32)

    @pl.when(k == pl.num_programs(2) - 1)
    def _():
        o_ref[...] = act(acc_ref[...] + b_ref[...]).astype(o_ref.dtype)


def linear_act_tiled(x_pad, w_pad, b_pad, act_name, tm, compute_dtype):
    """One Linear+activation, tiled. x_pad:(M_pad,K_pad) f32, w_pad:(K_pad,N_pad)."""
    M_pad, K_pad = x_pad.shape
    _, N_pad = w_pad.shape
    tk = _pick_feature_tile(K_pad)
    tn = _pick_feature_tile(N_pad)
    kernel = functools.partial(_tiled_linear_act_kernel,
                               act=_STR_TO_ACT[act_name],
                               compute_dtype=compute_dtype)
    return pl.pallas_call(
        kernel,
        out_shape=jax.ShapeDtypeStruct((M_pad, N_pad), jnp.float32),
        grid_spec=pltpu.PrefetchScalarGridSpec(
            num_scalar_prefetch=0,
            grid=(M_pad // tm, N_pad // tn, K_pad // tk),
            in_specs=[
                pl.BlockSpec((tm, tk), lambda i, j, k: (i, k)),
                pl.BlockSpec((tk, tn), lambda i, j, k: (k, j)),
                pl.BlockSpec((1, tn), lambda i, j, k: (0, j)),
            ],
            out_specs=pl.BlockSpec((tm, tn), lambda i, j, k: (i, j)),
            scratch_shapes=[pltpu.VMEM((tm, tn), jnp.float32)],
        ),
        compiler_params=pltpu.CompilerParams(
            dimension_semantics=("parallel", "parallel", "arbitrary"),
        ),
    )(x_pad, w_pad, b_pad)


# ------------------------------- MLP module ---------------------------------
class MLP:
    """JAX/Pallas port of the PyTorch MLP (same layer/activation semantics)."""

    def __init__(self, in_sizes, out_sizes, activation,
                 output_activation="leaky_relu", *, key,
                 param_dtype=jnp.bfloat16,
                 max_fused_weight_bytes=10 * (1 << 20)):
        self.layer_sizes = list(zip(in_sizes, out_sizes))
        self.n_layers = len(self.layer_sizes)
        self.param_dtype = param_dtype

        # per-layer activation names (mirrors the list-surgery in the reference)
        self.acts = [activation] * self.n_layers
        if self.n_layers > 0 and activation != output_activation:
            self.acts[-1] = output_activation

        # PyTorch-style init U(-1/sqrt(in), 1/sqrt(in)); keep f32 masters for the ref.
        self._ref_params = []
        for (in_size, out_size) in self.layer_sizes:
            key, kw, kb = jax.random.split(key, 3)
            bound = 1.0 / (in_size ** 0.5)
            w = jax.random.uniform(kw, (out_size, in_size), jnp.float32,
                                   minval=-bound, maxval=bound)
            b = jax.random.uniform(kb, (out_size,), jnp.float32,
                                   minval=-bound, maxval=bound)
            self._ref_params.append((w, b))

        # ---- pre-transposed, lane-padded (x128), low-precision storage (ONCE) ----
        all_dims = [d for pair in self.layer_sizes for d in pair] or [1]
        self._dmax = _round_up(max(all_dims), 128)
        stacked_bytes = (self.n_layers * self._dmax * self._dmax
                         * jnp.dtype(param_dtype).itemsize)
        self.fused = self.n_layers > 0 and stacked_bytes <= max_fused_weight_bytes

        if self.fused:
            w_stack, b_stack = [], []
            for (in_size, out_size), (w, b) in zip(self.layer_sizes, self._ref_params):
                wp = jnp.zeros((self._dmax, self._dmax), jnp.float32)
                wp = wp.at[:in_size, :out_size].set(w.T)       # (in, out) layout
                bp = jnp.zeros((1, self._dmax), jnp.float32)
                bp = bp.at[0, :out_size].set(b)
                w_stack.append(wp)
                b_stack.append(bp)
            self.w_stack = jnp.stack(w_stack).astype(param_dtype)  # (L, D, D)
            self.b_stack = jnp.stack(b_stack)                      # (L, 1, D) f32
        else:
            # TODO(synk): layers whose *individual* weight tiles exceed VMEM still
            # rely on the K/N tiling below; extremely large single layers could
            # additionally stream weights with manual DMA.
            self.w_list, self.b_list = [], []
            for (in_size, out_size), (w, b) in zip(self.layer_sizes, self._ref_params):
                in_pad = _round_up(in_size, 128)
                out_pad = _round_up(out_size, 128)
                wp = jnp.zeros((in_pad, out_pad), jnp.float32)
                wp = wp.at[:in_size, :out_size].set(w.T)
                bp = jnp.zeros((1, out_pad), jnp.float32)
                bp = bp.at[0, :out_size].set(b)
                self.w_list.append(wp.astype(param_dtype))
                self.b_list.append(bp)

    def __call__(self, x):
        if self.n_layers == 0:
            return x
        B = x.shape[0]
        in0 = self.layer_sizes[0][0]
        out_last = self.layer_sizes[-1][1]

        if self.fused:
            return mlp_fused_forward(x, self.w_stack, self.b_stack,
                                     self.acts, in0, out_last)

        # per-layer tiled path: keep activations padded (lane-dense) between layers
        tm = min(256, _round_up(B, 8))
        M_pad = _round_up(B, tm)
        in0_pad = _round_up(in0, 128)
        h = jnp.pad(x.astype(jnp.float32),
                    ((0, M_pad - B), (0, in0_pad - in0)))
        for l in range(self.n_layers):
            h = linear_act_tiled(h, self.w_list[l], self.b_list[l],
                                 self.acts[l], tm, self.param_dtype)
        return h[:B, :out_last]


# ---------------- pure-JAX reference (same bf16 matmul precision) -------------
def _mlp_ref(mlp, x):
    h = x.astype(jnp.float32)
    for (w, b), act in zip(mlp._ref_params, mlp.acts):
        wt = w.T.astype(mlp.param_dtype)
        y = jnp.dot(h.astype(mlp.param_dtype), wt,
                    preferred_element_type=jnp.float32) + b
        h = _STR_TO_ACT[act](y)
    return h


if __name__ == "__main__":
    key = jax.random.PRNGKey(0)
    k1, k2, kx1, kx2 = jax.random.split(key, 4)

    # --- fused path: whole MLP in ONE pallas_call, activations stay in VMEM ---
    in_sizes = [32, 64]
    out_sizes = [64, 16]
    mlp = MLP(in_sizes, out_sizes, activation="relu",
              output_activation="leaky_relu", key=k1)
    batch = 8
    x = jax.random.normal(kx1, (batch, in_sizes[0]), jnp.float32)
    out = jax.block_until_ready(mlp(x))
    ref = _mlp_ref(mlp, x)
    assert mlp.fused
    assert out.shape == (batch, out_sizes[-1])
    assert jnp.allclose(out, ref, atol=2e-3, rtol=2e-3), \
        float(jnp.max(jnp.abs(out - ref)))

    # --- forced per-layer K/N-tiled path (exercises padding with act(0) != 0) ---
    in_sizes2 = [40, 96]
    out_sizes2 = [96, 24]
    mlp2 = MLP(in_sizes2, out_sizes2, activation="sigmoid",
               output_activation="softplus", key=k2,
               max_fused_weight_bytes=0)
    x2 = jax.random.normal(kx2, (20, in_sizes2[0]), jnp.float32)
    out2 = jax.block_until_ready(mlp2(x2))
    ref2 = _mlp_ref(mlp2, x2)
    assert not mlp2.fused
    assert out2.shape == (20, out_sizes2[-1])
    assert jnp.allclose(out2, ref2, atol=2e-3, rtol=2e-3), \
        float(jnp.max(jnp.abs(out2 - ref2)))

    print("KERNEL_OK")
</pallas_src>

<mosaic_0001>
module attributes {stable_mosaic.version = 11 : i64} {
  func.func @_fused_mlp_kernel(%arg0: i32, %arg1: memref<8x128xf32, #tpu.memory_space<vmem>>, %arg2: memref<2x128x128xbf16, #tpu.memory_space<vmem>>, %arg3: memref<2x1x128xf32, #tpu.memory_space<vmem>>, %arg4: memref<8x128xf32, #tpu.memory_space<vmem>>) attributes {dimension_semantics = [#tpu.dimension_semantics<parallel>], iteration_bounds = array<i64: 1>, scalar_prefetch = 0 : i64, scratch_operands = 0 : i64, tpu.core_type = #tpu.core_type<tc>, window_params = [{transform_indices = @transform_0, window_bounds = array<i64: 8, 128>}, {pipeline_mode = #tpu.pipeline_mode<synchronous>, transform_indices = @transform_1, window_bounds = array<i64: 2, 128, 128>}, {pipeline_mode = #tpu.pipeline_mode<synchronous>, transform_indices = @transform_2, window_bounds = array<i64: 2, 1, 128>}, {transform_indices = @transform_3, window_bounds = array<i64: 8, 128>}]} {
    %c0 = arith.constant 0 : index
    %c0_0 = arith.constant 0 : index
    %0 = vector.load %arg1[%c0, %c0_0] : memref<8x128xf32, #tpu.memory_space<vmem>>, vector<8x128xf32>
    %1 = arith.truncf %0 : vector<8x128xf32> to vector<8x128xbf16>
    %c0_1 = arith.constant 0 : index
    %c0_2 = arith.constant 0 : index
    %c0_3 = arith.constant 0 : index
    %2 = vector.load %arg2[%c0_1, %c0_2, %c0_3] : memref<2x128x128xbf16, #tpu.memory_space<vmem>>, vector<1x128x128xbf16>
    %3 = vector.shape_cast %2 : vector<1x128x128xbf16> to vector<128x128xbf16>
    %cst = arith.constant dense<0.000000e+00> : vector<8x128xf32>
    %4 = tpu.matmul %1, %3, %cst {dimension_numbers = #tpu.dot_dimension_numbers<[1], [0], [0], [1], [0, 0, 1, 1], [], []>} : vector<8x128xbf16>, vector<128x128xbf16>, vector<8x128xf32> -> vector<8x128xf32>
    %c0_4 = arith.constant 0 : index
    %c0_5 = arith.constant 0 : index
    %c0_6 = arith.constant 0 : index
    %5 = vector.load %arg3[%c0_4, %c0_5, %c0_6] : memref<2x1x128xf32, #tpu.memory_space<vmem>>, vector<1x1x128xf32>
    %6 = vector.shape_cast %5 : vector<1x1x128xf32> to vector<1x128xf32>
    %7 = vector.broadcast %6 : vector<1x128xf32> to vector<8x128xf32>
    %8 = arith.addf %4, %7 : vector<8x128xf32>
    %cst_7 = arith.constant 0.000000e+00 : f32
    %9 = vector.broadcast %cst_7 : f32 to vector<8x128xf32>
    %10 = arith.maximumf %8, %9 : vector<8x128xf32>
    %11 = arith.truncf %10 : vector<8x128xf32> to vector<8x128xbf16>
    %c1 = arith.constant 1 : index
    %c0_8 = arith.constant 0 : index
    %c0_9 = arith.constant 0 : index
    %12 = vector.load %arg2[%c1, %c0_8, %c0_9] : memref<2x128x128xbf16, #tpu.memory_space<vmem>>, vector<1x128x128xbf16>
    %13 = vector.shape_cast %12 : vector<1x128x128xbf16> to vector<128x128xbf16>
    %cst_10 = arith.constant dense<0.000000e+00> : vector<8x128xf32>
    %14 = tpu.matmul %11, %13, %cst_10 {dimension_numbers = #tpu.dot_dimension_numbers<[1], [0], [0], [1], [0, 0, 1, 1], [], []>} : vector<8x128xbf16>, vector<128x128xbf16>, vector<8x128xf32> -> vector<8x128xf32>
    %c1_11 = arith.constant 1 : index
    %c0_12 = arith.constant 0 : index
    %c0_13 = arith.constant 0 : index
    %15 = vector.load %arg3[%c1_11, %c0_12, %c0_13] : memref<2x1x128xf32, #tpu.memory_space<vmem>>, vector<1x1x128xf32>
    %16 = vector.shape_cast %15 : vector<1x1x128xf32> to vector<1x128xf32>
    %17 = vector.broadcast %16 : vector<1x128xf32> to vector<8x128xf32>
    %18 = arith.addf %14, %17 : vector<8x128xf32>
    %cst_14 = arith.constant 0.000000e+00 : f32
    %19 = vector.broadcast %cst_14 : f32 to vector<8x128xf32>
    %20 = arith.cmpf oge, %18, %19 : vector<8x128xf32>
    %cst_15 = arith.constant 0.00999999977 : f32
    %21 = vector.broadcast %cst_15 : f32 to vector<8x128xf32>
    %22 = arith.mulf %21, %18 : vector<8x128xf32>
    %23 = arith.select %20, %18, %22 : vector<8x128xi1>, vector<8x128xf32>
    %c0_16 = arith.constant 0 : index
    %c0_17 = arith.constant 0 : index
    %24 = vector.load %arg4[%c0_16, %c0_17] : memref<8x128xf32, #tpu.memory_space<vmem>>, vector<8x128xf32>
    tpu.vector_store %arg4[%c0_16, %c0_17], %23 {strides = array<i32>} : memref<8x128xf32, #tpu.memory_space<vmem>>, vector<8x128xf32>,
    return
  }
  func.func @transform_0(%arg0: i32) -> (i32, i32) {
    %c0_i32 = arith.constant 0 : i32
    %c0_i32_0 = arith.constant 0 : i32
    return %arg0, %c0_i32 : i32, i32
  }
  func.func @transform_1(%arg0: i32) -> (i32, i32, i32) {
    %c0_i32 = arith.constant 0 : i32
    %c0_i32_0 = arith.constant 0 : i32
    %c0_i32_1 = arith.constant 0 : i32
    %c0_i32_2 = arith.constant 0 : i32
    return %c0_i32, %c0_i32_0, %c0_i32_1 : i32, i32, i32
  }
  func.func @transform_2(%arg0: i32) -> (i32, i32, i32) {
    %c0_i32 = arith.constant 0 : i32
    %c0_i32_0 = arith.constant 0 : i32
    %c0_i32_1 = arith.constant 0 : i32
    %c0_i32_2 = arith.constant 0 : i32
    return %c0_i32, %c0_i32_0, %c0_i32_1 : i32, i32, i32
  }
  func.func @transform_3(%arg0: i32) -> (i32, i32) {
    %c0_i32 = arith.constant 0 : i32
    %c0_i32_0 = arith.constant 0 : i32
    return %arg0, %c0_i32 : i32, i32
  }
}

</mosaic_0001>

<bundles_post_ra>
// kernel: tpu_custom_call.1
= control target key start
LH: loop header
LB: loop body
LE: loop exit
PB: predicated region body
PF: predicated region fallthrough
CT: control target
= control target key end

     0   :  { %8 = vsyncpa [#allocation3], 0  ;;  %s498_s0 = inlined_call_operand.hbm [shape: f32[8,128], index: 0, kind: input, shape index: {}]   ;;  %s499_s1 = inlined_call_operand.hbm [shape: bf16[2,128,128], index: 1, kind: input, shape index: {}]   ;;  %s500_s2 = inlined_call_operand.vmem [shape: f32[2,1,128], index: 2, kind: input, shape index: {}]   ;;  %s501_s3 = inlined_call_operand.hbm [shape: f32[8,128], index: 3, kind: output, shape index: {}]  }
   0x1   :  { %9 = vsyncpa [#allocation6], 0 }
   0x2   :  { %10 = vsyncpa [#allocation4], 0  ;;  %s456_s12 = smov [#allocation2]   ;;  %s457_s14 = smov [#allocation5]  }
   0x3   :  { %s17_s13 = sshll.u32 %s456_s12, 4  ;;  %s26_s15 = sshll.u32 %s457_s14, 4  ;;  %s18_s13 = int_to_ptr.vmem [resolvable:$true] %s17_s13  ;;  %s27_s15 = int_to_ptr.vmem [resolvable:$true] %s26_s15 }
   0x4   :  { %s398_s16 = scalar_lea.vmem %s18_s13, 128  ;;  %p403_p1 = scmp.lt.s32.totalorder %s18_s13, %s18_s13 }
   0x5   :  { %p399_p0 = scmp.ne.s32.totalorder %s18_s13, %s398_s16  ;;  %p404_p2 = scmp.lt.s32.totalorder %s398_s16, %s398_s16 }
   0x7   :  { %p405_p3 = por %p404_p2, %p403_p1 }
   0x9   :  { %p406_p4 = pnand %p405_p3, %p399_p0 }
   0xb   :  { %409 = shalt.err (!%p406_p4)
}
   0xc   :  { %20 = dma.hbm_to_vmem [thread:$0]  %s498_s0, 128, %s18_s13, [#allocation3]  }
   0xd   :  { %s418_s19 = scalar_lea.vmem %s27_s15, 2048  ;;  %p423_p6 = scmp.lt.s32.totalorder %s27_s15, %s27_s15 }
   0xe   :  { %p419_p5 = scmp.ne.s32.totalorder %s27_s15, %s418_s19  ;;  %p424_p7 = scmp.lt.s32.totalorder %s418_s19, %s418_s19 }
  0x10   :  { %p425_p8 = por %p424_p7, %p423_p6 }
  0x12   :  { %p426_p9 = pnand %p425_p8, %p419_p5 }
  0x14   :  { %429 = shalt.err (!%p426_p9)
}
  0x15   :  { %s458_s20 = smov 64   ;;  %s459_s21 = smov 4  }
  0x16   :  { %32 = dma.hbm_to_vmem [thread:$0]  %s499_s1, 2048, %s27_s15, [#allocation6], %s458_s20, %s458_s20, %s459_s21  }
  0x17   :  { %450 = dma.done.wait [#allocation3], 128  }
  0x18   :  { %451 = vsyncadd [#allocation3], 4294967168 }
  0x19   :  { %452 = dma.done.wait [#allocation6], 2048  }
  0x1a   :  { %453 = vsyncadd [#allocation6], 4294965248  ;;  %v460_v0 = vmov 0.0   ;;  %vm461_vm0 = vmmov 0   ;;  %v374_v1 = vld [vmem:[#allocation5 + $0x38] sm:$0xff]   ;;  %v375_v2 = vld [vmem:[#allocation5 + $0x30] sm:$0xff]  }
  0x1b   :  { %327 = vmatprep.subr.bf16.mxu0 %v460_v0  ;;  %343 = vmatprep.mubr.msk.bf16.mxu0 %vm461_vm0, %v460_v0  ;;  %v376_v3 = vld [vmem:[#allocation5 + $0x28] sm:$0xff]   ;;  %v382_v4 = vld [vmem:[#allocation5 + $0x78] sm:$0xff]   ;;  %v377_v5 = vld [vmem:[#allocation5 + $0x20] sm:$0xff]   ;;  %s462_s26 = smov [#allocation7]  }
  0x1c   :  { %347 = vmatprep.subr.bf16.mxu1 %v460_v0  ;;  %363 = vmatprep.mubr.msk.bf16.mxu1 %vm461_vm0, %v460_v0  ;;  %v383_v6 = vld [vmem:[#allocation5 + $0x70] sm:$0xff]   ;;  %v378_v7 = vld [vmem:[#allocation5 + $0x18] sm:$0xff]   ;;  %v384_v8 = vld [vmem:[#allocation5 + $0x68] sm:$0xff]   ;;  %s280_s27 = sshll.u32 %s462_s26, 4  ;;  %s281_s27 = int_to_ptr.vmem [resolvable:$true] %s280_s27 }
  0x1d   :  { %328 = vmatpush3.bf16.msra.mxu0 %v374_v1  ;;  %348 = vmatpush3.bf16.msra.mxu1 %v382_v4  ;;  %v379_v9 = vld [vmem:[#allocation5 + $0x10] sm:$0xff]   ;;  %v385_v10 = vld [vmem:[#allocation5 + $0x60] sm:$0xff]   ;;  %v380_v11 = vld [vmem:[#allocation5 + $0x8] sm:$0xff]   ;;  %s430_s28 = scalar_lea.vmem %s281_s27, 128  ;;  %p435_p11 = scmp.lt.s32.totalorder %s281_s27, %s281_s27 }
  0x1e   :  { %329 = vmatprep.subr.bf16.mxu0 %v460_v0  ;;  %349 = vmatprep.subr.bf16.mxu1 %v460_v0  ;;  %v386_v12 = vld [vmem:[#allocation5 + $0x58] sm:$0xff]   ;;  %v381_v13 = vld [vmem:[#allocation5] sm:$0xff]   ;;  %v387_v15 = vld [vmem:[#allocation5 + $0x50] sm:$0xff]   ;;  %p431_p10 = scmp.ne.s32.totalorder %s281_s27, %s430_s28  ;;  %p436_p12 = scmp.lt.s32.totalorder %s430_s28, %s430_s28 }
  0x1f   :  { %v42_v14 = vld [vmem:[#allocation2] sm:$0xff]  ;;  %v388_v17 = vld [vmem:[#allocation5 + $0x48] sm:$0xff]   ;;  %v389_v18 = vld [vmem:[#allocation5 + $0x40] sm:$0xff]  }
  0x20   :  { %v43_v16 = vpack.c.bf16 %v42_v14, %v42_v14  ;;  %v290_v19 = vld [vmem:[%s500_s2] ss:$0 sm:$0xff]  ;;  %v300_v27 = vld [vmem:[%s500_s2 + $0x1] ss:$0 sm:$0xff]  ;;  %p437_p13 = por %p436_p12, %p435_p11 }
  0x21   :  { %330 = vmatpush3.bf16.msra.mxu0 %v375_v2  ;;  %350 = vmatpush3.bf16.msra.mxu1 %v383_v6 }
  0x22   :  { %331 = vmatprep.subr.bf16.mxu0 %v460_v0  ;;  %351 = vmatprep.subr.bf16.mxu1 %v460_v0  ;;  %p438_p0 = pnand %p437_p13, %p431_p10 }
  0x25   :  { %332 = vmatpush3.bf16.msra.mxu0 %v376_v3  ;;  %352 = vmatpush3.bf16.msra.mxu1 %v384_v8 }
  0x26   :  { %333 = vmatprep.subr.bf16.mxu0 %v460_v0  ;;  %353 = vmatprep.subr.bf16.mxu1 %v460_v0 }
  0x29   :  { %334 = vmatpush3.bf16.msra.mxu0 %v377_v5  ;;  %354 = vmatpush3.bf16.msra.mxu1 %v385_v10 }
  0x2a   :  { %335 = vmatprep.subr.bf16.mxu0 %v460_v0  ;;  %355 = vmatprep.subr.bf16.mxu1 %v460_v0 }
  0x2d   :  { %336 = vmatpush3.bf16.msra.mxu0 %v378_v7  ;;  %356 = vmatpush3.bf16.msra.mxu1 %v386_v12 }
  0x2e   :  { %337 = vmatprep.subr.bf16.mxu0 %v460_v0  ;;  %357 = vmatprep.subr.bf16.mxu1 %v460_v0 }
  0x31   :  { %338 = vmatpush3.bf16.msra.mxu0 %v379_v9  ;;  %358 = vmatpush3.bf16.msra.mxu1 %v387_v15 }
  0x32   :  { %339 = vmatprep.subr.bf16.mxu0 %v460_v0  ;;  %359 = vmatprep.subr.bf16.mxu1 %v460_v0 }
  0x35   :  { %340 = vmatpush3.bf16.msra.mxu0 %v380_v11  ;;  %360 = vmatpush3.bf16.msra.mxu1 %v388_v17 }
  0x36   :  { %341 = vmatprep.subr.bf16.mxu0 %v460_v0  ;;  %361 = vmatprep.subr.bf16.mxu1 %v460_v0 }
  0x39   :  { %342 = vmatpush3.bf16.msra.mxu0 %v381_v13  ;;  %362 = vmatpush3.bf16.msra.mxu1 %v389_v18 }
  0x3c   :  { %344 = vmatmul.mubr.bf16.vlgmr.msra.gmra.mxu0 %v43_v16 }
  0xfc   :  { %v149_v20 = vpop.f32.mrf.mxu0 }
  0xfd   :  { %v150_v21 = vadd.f32 %v290_v19, %v149_v20 }
  0xfe   :  { %v345_v22 = vpop.f32.mrf.mxu0 }
  0xff   :  { %v155_v23 = vmax.f32 %v150_v21, 0.0 }
 0x100   :  { %v152_v24 = vpop.f32.mrf.mxu0 }
 0x101   :  { %v156_v25 = vpack.c.bf16 %v155_v23, %v155_v23 }
 0x102   :  { %v346_v26 = vpop.f32.mrf.mxu0 }
 0x103   :  { %364 = vmatmul.mubr.bf16.vlgmr.msra.gmra.mxu1 %v156_v25 }
 0x1c3   :  { %v264_v28 = vpop.f32.mrf.mxu1 }
 0x1c4   :  { %v265_v29 = vadd.f32 %v300_v27, %v264_v28 }
 0x1c5   :  { %v365_v30 = vpop.f32.mrf.mxu1 }
 0x1c6   :  { %v271_v31 = vmul.f32 0.01, %v265_v29  ;;  %vm270_vm1 = vcmp.ge.f32.partialorder %v265_v29, 0.0 }
 0x1c7   :  { %v267_v32 = vpop.f32.mrf.mxu1 }
 0x1c8   :  { %v272_v33 = vsel %vm270_vm1, %v265_v29, %v271_v31 }
 0x1c9   :  { %v366_v34 = vpop.f32.mrf.mxu1  ;;  %273 = vst [vmem:[#allocation7] sm:$0xff] %v272_v33 }
 0x1ca   :  { %441 = shalt.err (!%p438_p0)
}
 0x1cb   :  { %283 = dma.vmem_to_hbm [thread:$0]  %s281_s27, 128, %s501_s3, [#allocation4]  }
 0x1cc   :  { %454 = dma.done.wait [#allocation4], 128  }
 0x1cd   :  { %455 = vsyncadd [#allocation4], 4294967168 }
 0x1ce   :  { %287 = vsyncpa [#allocation3], 1 }
 0x1cf   :  { %288 = vsyncpa [#allocation6], 1 }
 0x1d0   :  { %289 = vsyncpa [#allocation4], 1 }

</bundles_post_ra>
